<compile_context>
chip_gen: v6e
topology: v6e:2x2x1
jax: 0.10.0
libtpu: 0.0.40
codegen_flags: <defaults>
</compile_context>

<pallas_src>
import jax
import jax.numpy as jnp
from jax.experimental import pallas as pl
from jax.experimental.pallas import tpu as pltpu


def _norm_conv1x1_kernel(x_ref, w_ref, b_ref, o_ref):
    # x_ref: VMEM (C, HW_TILE)  one (batch, spatial-tile) slab; spatial on lanes.
    # w_ref: SMEM (C, K)        normalization-folded 1x1-conv weight.
    # b_ref: SMEM (1, K)        normalization-folded bias.
    # o_ref: VMEM (K, HW_TILE)
    x = x_ref[...]                                   # (C, HW_TILE)
    c_dim = x_ref.shape[0]
    k_dim = o_ref.shape[0]
    for k in range(k_dim):                           # K chains of C broadcast-FMAs (VPU only)
        acc = x[0:1, :] * w_ref[0, k]
        for c in range(1, c_dim):
            acc = acc + x[c:c + 1, :] * w_ref[c, k]
        o_ref[k:k + 1, :] = acc + b_ref[0, k]        # lane-dense store (last dim = HW_TILE)


def _pick_hw_tile(hw, target=2048):
    """Largest multiple of 128 that divides hw and is <= target; else full hw."""
    if hw % 128 != 0:
        return hw                                    # full-extent block is always legal
    t = min(hw, target)
    t -= t % 128
    while t >= 128:
        if hw % t == 0:
            return t
        t -= 128
    return hw


def normalization_wrapper_forward(x_nchw, mean, std, w, b):
    """Equivalent of NormalizationWrapper(model=1x1 Conv2d).forward(x).

    x_nchw: (N, C, H, W) f32
    mean, std: (C,) f32   (PyTorch buffers are (C,1,1); kept as (C,))
    w: (C, K) f32         (1x1 conv weight reshaped from (K, C, 1, 1))
    b: (K,) f32
    returns: (N, K, H, W) f32
    """
    N, C, H, W = x_nchw.shape
    K = w.shape[1]
    HW = H * W

    # Fold (x - mean)/std into the linear model (exact up to fp32 rounding).
    inv_std = 1.0 / std
    w_folded = (w * inv_std[:, None]).astype(jnp.float32)        # (C, K)
    b_folded = (b - (mean * inv_std) @ w).astype(jnp.float32)    # (K,)
    b_folded = b_folded.reshape(1, K)

    # Free reshape, no transpose: NCHW stays NCHW.
    x_rows = x_nchw.reshape(N, C, HW)

    hw_tile = _pick_hw_tile(HW)
    grid = (N, HW // hw_tile)

    out = pl.pallas_call(
        _norm_conv1x1_kernel,
        out_shape=jax.ShapeDtypeStruct((N, K, HW), jnp.float32),
        grid_spec=pltpu.PrefetchScalarGridSpec(
            num_scalar_prefetch=0,
            grid=grid,
            in_specs=[
                pl.BlockSpec((None, C, hw_tile), lambda n, s: (n, 0, s)),   # x slab
                pl.BlockSpec(memory_space=pltpu.MemorySpace.SMEM),          # W' scalars
                pl.BlockSpec(memory_space=pltpu.MemorySpace.SMEM),          # b' scalars
            ],
            out_specs=pl.BlockSpec((None, K, hw_tile), lambda n, s: (n, 0, s)),
        ),
        compiler_params=pltpu.CompilerParams(
            dimension_semantics=("parallel", "parallel"),
        ),
    )(x_rows, w_folded, b_folded)

    # Free reshape back to NCHW.
    return out.reshape(N, K, H, W)

    # TODO(synk): carry x / out in bfloat16 (f32 accumulate in-kernel) if the
    # surrounding model tolerates it -- halves HBM bytes on this mem-bound op.


if __name__ == "__main__":
    # Small shapes consistent with the module: batch=2, channels=4, spatial=16.
    N, C, H, W = 2, 4, 16, 16
    K = 8  # synthetic model's output channels

    key = jax.random.PRNGKey(0)
    kx, kw, kb = jax.random.split(key, 3)

    x = jax.random.normal(kx, (N, C, H, W), dtype=jnp.float32)

    # Deterministic normalization buffers (ImageNet-like, synthetic 4th channel).
    mean = jnp.array([0.485, 0.456, 0.406, 0.5], dtype=jnp.float32)
    std = jnp.array([0.229, 0.224, 0.225, 0.25], dtype=jnp.float32)

    # Deterministic synthetic model params: 1x1 conv (K, C, 1, 1) -> (C, K).
    w = jax.random.normal(kw, (C, K), dtype=jnp.float32) * 0.1
    b = jax.random.normal(kb, (K,), dtype=jnp.float32) * 0.01

    fwd = jax.jit(normalization_wrapper_forward)
    out = jax.block_until_ready(fwd(x, mean, std, w, b))

    # Pure-JAX reference (un-folded: subtract-then-divide, then 1x1 conv).
    x_norm_ref = (x - mean[None, :, None, None]) / std[None, :, None, None]
    ref = jnp.einsum("nchw,ck->nkhw", x_norm_ref, w) + b[None, :, None, None]
    assert out.shape == (N, K, H, W)
    assert jnp.allclose(out, ref, atol=1e-4, rtol=1e-4), float(
        jnp.max(jnp.abs(out - ref))
    )

    print("KERNEL_OK")
</pallas_src>

<mosaic_0001>
module attributes {stable_mosaic.version = 11 : i64} {
  func.func @_norm_conv1x1_kernel(%arg0: i32, %arg1: i32, %arg2: memref<1x4x256xf32, #tpu.memory_space<vmem>>, %arg3: memref<4x8xf32, #tpu.memory_space<smem>>, %arg4: memref<1x8xf32, #tpu.memory_space<smem>>, %arg5: memref<1x8x256xf32, #tpu.memory_space<vmem>>) attributes {dimension_semantics = [#tpu.dimension_semantics<parallel>, #tpu.dimension_semantics<parallel>], iteration_bounds = array<i64: 2, 1>, scalar_prefetch = 0 : i64, scratch_operands = 0 : i64, tpu.core_type = #tpu.core_type<tc>, window_params = [{transform_indices = @transform_0, window_bounds = array<i64: 1, 4, 256>}, {transform_indices = @transform_1, window_bounds = array<i64: 4, 8>}, {transform_indices = @transform_2, window_bounds = array<i64: 1, 8>}, {transform_indices = @transform_3, window_bounds = array<i64: 1, 8, 256>}]} {
    %c0 = arith.constant 0 : index
    %c0_0 = arith.constant 0 : index
    %c0_1 = arith.constant 0 : index
    %0 = vector.load %arg2[%c0, %c0_0, %c0_1] : memref<1x4x256xf32, #tpu.memory_space<vmem>>, vector<1x4x256xf32>
    %1 = vector.shape_cast %0 : vector<1x4x256xf32> to vector<4x256xf32>
    %2 = vector.extract_strided_slice %1 {offsets = [0, 0], sizes = [1, 256], strides = [1, 1]} : vector<4x256xf32> to vector<1x256xf32>
    %c0_2 = arith.constant 0 : index
    %c0_3 = arith.constant 0 : index
    %3 = memref.load %arg3[%c0_2, %c0_3] : memref<4x8xf32, #tpu.memory_space<smem>>
    %4 = vector.broadcast %3 : f32 to vector<1x256xf32>
    %5 = arith.mulf %2, %4 : vector<1x256xf32>
    %6 = vector.extract_strided_slice %1 {offsets = [1, 0], sizes = [1, 256], strides = [1, 1]} : vector<4x256xf32> to vector<1x256xf32>
    %c1 = arith.constant 1 : index
    %c0_4 = arith.constant 0 : index
    %7 = memref.load %arg3[%c1, %c0_4] : memref<4x8xf32, #tpu.memory_space<smem>>
    %8 = vector.broadcast %7 : f32 to vector<1x256xf32>
    %9 = arith.mulf %6, %8 : vector<1x256xf32>
    %10 = arith.addf %5, %9 : vector<1x256xf32>
    %11 = vector.extract_strided_slice %1 {offsets = [2, 0], sizes = [1, 256], strides = [1, 1]} : vector<4x256xf32> to vector<1x256xf32>
    %c2 = arith.constant 2 : index
    %c0_5 = arith.constant 0 : index
    %12 = memref.load %arg3[%c2, %c0_5] : memref<4x8xf32, #tpu.memory_space<smem>>
    %13 = vector.broadcast %12 : f32 to vector<1x256xf32>
    %14 = arith.mulf %11, %13 : vector<1x256xf32>
    %15 = arith.addf %10, %14 : vector<1x256xf32>
    %16 = vector.extract_strided_slice %1 {offsets = [3, 0], sizes = [1, 256], strides = [1, 1]} : vector<4x256xf32> to vector<1x256xf32>
    %c3 = arith.constant 3 : index
    %c0_6 = arith.constant 0 : index
    %17 = memref.load %arg3[%c3, %c0_6] : memref<4x8xf32, #tpu.memory_space<smem>>
    %18 = vector.broadcast %17 : f32 to vector<1x256xf32>
    %19 = arith.mulf %16, %18 : vector<1x256xf32>
    %20 = arith.addf %15, %19 : vector<1x256xf32>
    %c0_7 = arith.constant 0 : index
    %c0_8 = arith.constant 0 : index
    %21 = memref.load %arg4[%c0_7, %c0_8] : memref<1x8xf32, #tpu.memory_space<smem>>
    %22 = vector.broadcast %21 : f32 to vector<1x256xf32>
    %23 = arith.addf %20, %22 : vector<1x256xf32>
    %c0_9 = arith.constant 0 : index
    %c0_10 = arith.constant 0 : index
    %c0_11 = arith.constant 0 : index
    %24 = vector.load %arg5[%c0_9, %c0_10, %c0_11] : memref<1x8x256xf32, #tpu.memory_space<vmem>>, vector<1x1x256xf32>
    %25 = vector.shape_cast %24 : vector<1x1x256xf32> to vector<1x256xf32>
    %26 = vector.shape_cast %23 : vector<1x256xf32> to vector<1x1x256xf32>
    tpu.vector_store %arg5[%c0_9, %c0_10, %c0_11], %26 {strides = array<i32>} : memref<1x8x256xf32, #tpu.memory_space<vmem>>, vector<1x1x256xf32>,
    %27 = vector.extract_strided_slice %1 {offsets = [0, 0], sizes = [1, 256], strides = [1, 1]} : vector<4x256xf32> to vector<1x256xf32>
    %c0_12 = arith.constant 0 : index
    %c1_13 = arith.constant 1 : index
    %28 = memref.load %arg3[%c0_12, %c1_13] : memref<4x8xf32, #tpu.memory_space<smem>>
    %29 = vector.broadcast %28 : f32 to vector<1x256xf32>
    %30 = arith.mulf %27, %29 : vector<1x256xf32>
    %31 = vector.extract_strided_slice %1 {offsets = [1, 0], sizes = [1, 256], strides = [1, 1]} : vector<4x256xf32> to vector<1x256xf32>
    %c1_14 = arith.constant 1 : index
    %c1_15 = arith.constant 1 : index
    %32 = memref.load %arg3[%c1_14, %c1_15] : memref<4x8xf32, #tpu.memory_space<smem>>
    %33 = vector.broadcast %32 : f32 to vector<1x256xf32>
    %34 = arith.mulf %31, %33 : vector<1x256xf32>
    %35 = arith.addf %30, %34 : vector<1x256xf32>
    %36 = vector.extract_strided_slice %1 {offsets = [2, 0], sizes = [1, 256], strides = [1, 1]} : vector<4x256xf32> to vector<1x256xf32>
    %c2_16 = arith.constant 2 : index
    %c1_17 = arith.constant 1 : index
    %37 = memref.load %arg3[%c2_16, %c1_17] : memref<4x8xf32, #tpu.memory_space<smem>>
    %38 = vector.broadcast %37 : f32 to vector<1x256xf32>
    %39 = arith.mulf %36, %38 : vector<1x256xf32>
    %40 = arith.addf %35, %39 : vector<1x256xf32>
    %41 = vector.extract_strided_slice %1 {offsets = [3, 0], sizes = [1, 256], strides = [1, 1]} : vector<4x256xf32> to vector<1x256xf32>
    %c3_18 = arith.constant 3 : index
    %c1_19 = arith.constant 1 : index
    %42 = memref.load %arg3[%c3_18, %c1_19] : memref<4x8xf32, #tpu.memory_space<smem>>
    %43 = vector.broadcast %42 : f32 to vector<1x256xf32>
    %44 = arith.mulf %41, %43 : vector<1x256xf32>
    %45 = arith.addf %40, %44 : vector<1x256xf32>
    %c0_20 = arith.constant 0 : index
    %c1_21 = arith.constant 1 : index
    %46 = memref.load %arg4[%c0_20, %c1_21] : memref<1x8xf32, #tpu.memory_space<smem>>
    %47 = vector.broadcast %46 : f32 to vector<1x256xf32>
    %48 = arith.addf %45, %47 : vector<1x256xf32>
    %c0_22 = arith.constant 0 : index
    %c1_23 = arith.constant 1 : index
    %c0_24 = arith.constant 0 : index
    %49 = vector.load %arg5[%c0_22, %c1_23, %c0_24] : memref<1x8x256xf32, #tpu.memory_space<vmem>>, vector<1x1x256xf32>
    %50 = vector.shape_cast %49 : vector<1x1x256xf32> to vector<1x256xf32>
    %51 = vector.shape_cast %48 : vector<1x256xf32> to vector<1x1x256xf32>
    tpu.vector_store %arg5[%c0_22, %c1_23, %c0_24], %51 {strides = array<i32>} : memref<1x8x256xf32, #tpu.memory_space<vmem>>, vector<1x1x256xf32>,
    %52 = vector.extract_strided_slice %1 {offsets = [0, 0], sizes = [1, 256], strides = [1, 1]} : vector<4x256xf32> to vector<1x256xf32>
    %c0_25 = arith.constant 0 : index
    %c2_26 = arith.constant 2 : index
    %53 = memref.load %arg3[%c0_25, %c2_26] : memref<4x8xf32, #tpu.memory_space<smem>>
    %54 = vector.broadcast %53 : f32 to vector<1x256xf32>
    %55 = arith.mulf %52, %54 : vector<1x256xf32>
    %56 = vector.extract_strided_slice %1 {offsets = [1, 0], sizes = [1, 256], strides = [1, 1]} : vector<4x256xf32> to vector<1x256xf32>
    %c1_27 = arith.constant 1 : index
    %c2_28 = arith.constant 2 : index
    %57 = memref.load %arg3[%c1_27, %c2_28] : memref<4x8xf32, #tpu.memory_space<smem>>
    %58 = vector.broadcast %57 : f32 to vector<1x256xf32>
    %59 = arith.mulf %56, %58 : vector<1x256xf32>
    %60 = arith.addf %55, %59 : vector<1x256xf32>
    %61 = vector.extract_strided_slice %1 {offsets = [2, 0], sizes = [1, 256], strides = [1, 1]} : vector<4x256xf32> to vector<1x256xf32>
    %c2_29 = arith.constant 2 : index
    %c2_30 = arith.constant 2 : index
    %62 = memref.load %arg3[%c2_29, %c2_30] : memref<4x8xf32, #tpu.memory_space<smem>>
    %63 = vector.broadcast %62 : f32 to vector<1x256xf32>
    %64 = arith.mulf %61, %63 : vector<1x256xf32>
    %65 = arith.addf %60, %64 : vector<1x256xf32>
    %66 = vector.extract_strided_slice %1 {offsets = [3, 0], sizes = [1, 256], strides = [1, 1]} : vector<4x256xf32> to vector<1x256xf32>
    %c3_31 = arith.constant 3 : index
    %c2_32 = arith.constant 2 : index
    %67 = memref.load %arg3[%c3_31, %c2_32] : memref<4x8xf32, #tpu.memory_space<smem>>
    %68 = vector.broadcast %67 : f32 to vector<1x256xf32>
    %69 = arith.mulf %66, %68 : vector<1x256xf32>
    %70 = arith.addf %65, %69 : vector<1x256xf32>
    %c0_33 = arith.constant 0 : index
    %c2_34 = arith.constant 2 : index
    %71 = memref.load %arg4[%c0_33, %c2_34] : memref<1x8xf32, #tpu.memory_space<smem>>
    %72 = vector.broadcast %71 : f32 to vector<1x256xf32>
    %73 = arith.addf %70, %72 : vector<1x256xf32>
    %c0_35 = arith.constant 0 : index
    %c2_36 = arith.constant 2 : index
    %c0_37 = arith.constant 0 : index
    %74 = vector.load %arg5[%c0_35, %c2_36, %c0_37] : memref<1x8x256xf32, #tpu.memory_space<vmem>>, vector<1x1x256xf32>
    %75 = vector.shape_cast %74 : vector<1x1x256xf32> to vector<1x256xf32>
    %76 = vector.shape_cast %73 : vector<1x256xf32> to vector<1x1x256xf32>
    tpu.vector_store %arg5[%c0_35, %c2_36, %c0_37], %76 {strides = array<i32>} : memref<1x8x256xf32, #tpu.memory_space<vmem>>, vector<1x1x256xf32>,
    %77 = vector.extract_strided_slice %1 {offsets = [0, 0], sizes = [1, 256], strides = [1, 1]} : vector<4x256xf32> to vector<1x256xf32>
    %c0_38 = arith.constant 0 : index
    %c3_39 = arith.constant 3 : index
    %78 = memref.load %arg3[%c0_38, %c3_39] : memref<4x8xf32, #tpu.memory_space<smem>>
    %79 = vector.broadcast %78 : f32 to vector<1x256xf32>
    %80 = arith.mulf %77, %79 : vector<1x256xf32>
    %81 = vector.extract_strided_slice %1 {offsets = [1, 0], sizes = [1, 256], strides = [1, 1]} : vector<4x256xf32> to vector<1x256xf32>
    %c1_40 = arith.constant 1 : index
    %c3_41 = arith.constant 3 : index
    %82 = memref.load %arg3[%c1_40, %c3_41] : memref<4x8xf32, #tpu.memory_space<smem>>
    %83 = vector.broadcast %82 : f32 to vector<1x256xf32>
    %84 = arith.mulf %81, %83 : vector<1x256xf32>
    %85 = arith.addf %80, %84 : vector<1x256xf32>
    %86 = vector.extract_strided_slice %1 {offsets = [2, 0], sizes = [1, 256], strides = [1, 1]} : vector<4x256xf32> to vector<1x256xf32>
    %c2_42 = arith.constant 2 : index
    %c3_43 = arith.constant 3 : index
    %87 = memref.load %arg3[%c2_42, %c3_43] : memref<4x8xf32, #tpu.memory_space<smem>>
    %88 = vector.broadcast %87 : f32 to vector<1x256xf32>
    %89 = arith.mulf %86, %88 : vector<1x256xf32>
    %90 = arith.addf %85, %89 : vector<1x256xf32>
    %91 = vector.extract_strided_slice %1 {offsets = [3, 0], sizes = [1, 256], strides = [1, 1]} : vector<4x256xf32> to vector<1x256xf32>
    %c3_44 = arith.constant 3 : index
    %c3_45 = arith.constant 3 : index
    %92 = memref.load %arg3[%c3_44, %c3_45] : memref<4x8xf32, #tpu.memory_space<smem>>
    %93 = vector.broadcast %92 : f32 to vector<1x256xf32>
    %94 = arith.mulf %91, %93 : vector<1x256xf32>
    %95 = arith.addf %90, %94 : vector<1x256xf32>
    %c0_46 = arith.constant 0 : index
    %c3_47 = arith.constant 3 : index
    %96 = memref.load %arg4[%c0_46, %c3_47] : memref<1x8xf32, #tpu.memory_space<smem>>
    %97 = vector.broadcast %96 : f32 to vector<1x256xf32>
    %98 = arith.addf %95, %97 : vector<1x256xf32>
    %c0_48 = arith.constant 0 : index
    %c3_49 = arith.constant 3 : index
    %c0_50 = arith.constant 0 : index
    %99 = vector.load %arg5[%c0_48, %c3_49, %c0_50] : memref<1x8x256xf32, #tpu.memory_space<vmem>>, vector<1x1x256xf32>
    %100 = vector.shape_cast %99 : vector<1x1x256xf32> to vector<1x256xf32>
    %101 = vector.shape_cast %98 : vector<1x256xf32> to vector<1x1x256xf32>
    tpu.vector_store %arg5[%c0_48, %c3_49, %c0_50], %101 {strides = array<i32>} : memref<1x8x256xf32, #tpu.memory_space<vmem>>, vector<1x1x256xf32>,
    %102 = vector.extract_strided_slice %1 {offsets = [0, 0], sizes = [1, 256], strides = [1, 1]} : vector<4x256xf32> to vector<1x256xf32>
    %c0_51 = arith.constant 0 : index
    %c4 = arith.constant 4 : index
    %103 = memref.load %arg3[%c0_51, %c4] : memref<4x8xf32, #tpu.memory_space<smem>>
    %104 = vector.broadcast %103 : f32 to vector<1x256xf32>
    %105 = arith.mulf %102, %104 : vector<1x256xf32>
    %106 = vector.extract_strided_slice %1 {offsets = [1, 0], sizes = [1, 256], strides = [1, 1]} : vector<4x256xf32> to vector<1x256xf32>
    %c1_52 = arith.constant 1 : index
    %c4_53 = arith.constant 4 : index
    %107 = memref.load %arg3[%c1_52, %c4_53] : memref<4x8xf32, #tpu.memory_space<smem>>
    %108 = vector.broadcast %107 : f32 to vector<1x256xf32>
    %109 = arith.mulf %106, %108 : vector<1x256xf32>
    %110 = arith.addf %105, %109 : vector<1x256xf32>
    %111 = vector.extract_strided_slice %1 {offsets = [2, 0], sizes = [1, 256], strides = [1, 1]} : vector<4x256xf32> to vector<1x256xf32>
    %c2_54 = arith.constant 2 : index
    %c4_55 = arith.constant 4 : index
    %112 = memref.load %arg3[%c2_54, %c4_55] : memref<4x8xf32, #tpu.memory_space<smem>>
    %113 = vector.broadcast %112 : f32 to vector<1x256xf32>
    %114 = arith.mulf %111, %113 : vector<1x256xf32>
    %115 = arith.addf %110, %114 : vector<1x256xf32>
    %116 = vector.extract_strided_slice %1 {offsets = [3, 0], sizes = [1, 256], strides = [1, 1]} : vector<4x256xf32> to vector<1x256xf32>
    %c3_56 = arith.constant 3 : index
    %c4_57 = arith.constant 4 : index
    %117 = memref.load %arg3[%c3_56, %c4_57] : memref<4x8xf32, #tpu.memory_space<smem>>
    %118 = vector.broadcast %117 : f32 to vector<1x256xf32>
    %119 = arith.mulf %116, %118 : vector<1x256xf32>
    %120 = arith.addf %115, %119 : vector<1x256xf32>
    %c0_58 = arith.constant 0 : index
    %c4_59 = arith.constant 4 : index
    %121 = memref.load %arg4[%c0_58, %c4_59] : memref<1x8xf32, #tpu.memory_space<smem>>
    %122 = vector.broadcast %121 : f32 to vector<1x256xf32>
    %123 = arith.addf %120, %122 : vector<1x256xf32>
    %c0_60 = arith.constant 0 : index
    %c4_61 = arith.constant 4 : index
    %c0_62 = arith.constant 0 : index
    %124 = vector.load %arg5[%c0_60, %c4_61, %c0_62] : memref<1x8x256xf32, #tpu.memory_space<vmem>>, vector<1x1x256xf32>
    %125 = vector.shape_cast %124 : vector<1x1x256xf32> to vector<1x256xf32>
    %126 = vector.shape_cast %123 : vector<1x256xf32> to vector<1x1x256xf32>
    tpu.vector_store %arg5[%c0_60, %c4_61, %c0_62], %126 {strides = array<i32>} : memref<1x8x256xf32, #tpu.memory_space<vmem>>, vector<1x1x256xf32>,
    %127 = vector.extract_strided_slice %1 {offsets = [0, 0], sizes = [1, 256], strides = [1, 1]} : vector<4x256xf32> to vector<1x256xf32>
    %c0_63 = arith.constant 0 : index
    %c5 = arith.constant 5 : index
    %128 = memref.load %arg3[%c0_63, %c5] : memref<4x8xf32, #tpu.memory_space<smem>>
    %129 = vector.broadcast %128 : f32 to vector<1x256xf32>
    %130 = arith.mulf %127, %129 : vector<1x256xf32>
    %131 = vector.extract_strided_slice %1 {offsets = [1, 0], sizes = [1, 256], strides = [1, 1]} : vector<4x256xf32> to vector<1x256xf32>
    %c1_64 = arith.constant 1 : index
    %c5_65 = arith.constant 5 : index
    %132 = memref.load %arg3[%c1_64, %c5_65] : memref<4x8xf32, #tpu.memory_space<smem>>
    %133 = vector.broadcast %132 : f32 to vector<1x256xf32>
    %134 = arith.mulf %131, %133 : vector<1x256xf32>
    %135 = arith.addf %130, %134 : vector<1x256xf32>
    %136 = vector.extract_strided_slice %1 {offsets = [2, 0], sizes = [1, 256], strides = [1, 1]} : vector<4x256xf32> to vector<1x256xf32>
    %c2_66 = arith.constant 2 : index
    %c5_67 = arith.constant 5 : index
    %137 = memref.load %arg3[%c2_66, %c5_67] : memref<4x8xf32, #tpu.memory_space<smem>>
    %138 = vector.broadcast %137 : f32 to vector<1x256xf32>
    %139 = arith.mulf %136, %138 : vector<1x256xf32>
    %140 = arith.addf %135, %139 : vector<1x256xf32>
    %141 = vector.extract_strided_slice %1 {offsets = [3, 0], sizes = [1, 256], strides = [1, 1]} : vector<4x256xf32> to vector<1x256xf32>
    %c3_68 = arith.constant 3 : index
    %c5_69 = arith.constant 5 : index
    %142 = memref.load %arg3[%c3_68, %c5_69] : memref<4x8xf32, #tpu.memory_space<smem>>
    %143 = vector.broadcast %142 : f32 to vector<1x256xf32>
    %144 = arith.mulf %141, %143 : vector<1x256xf32>
    %145 = arith.addf %140, %144 : vector<1x256xf32>
    %c0_70 = arith.constant 0 : index
    %c5_71 = arith.constant 5 : index
    %146 = memref.load %arg4[%c0_70, %c5_71] : memref<1x8xf32, #tpu.memory_space<smem>>
    %147 = vector.broadcast %146 : f32 to vector<1x256xf32>
    %148 = arith.addf %145, %147 : vector<1x256xf32>
    %c0_72 = arith.constant 0 : index
    %c5_73 = arith.constant 5 : index
    %c0_74 = arith.constant 0 : index
    %149 = vector.load %arg5[%c0_72, %c5_73, %c0_74] : memref<1x8x256xf32, #tpu.memory_space<vmem>>, vector<1x1x256xf32>
    %150 = vector.shape_cast %149 : vector<1x1x256xf32> to vector<1x256xf32>
    %151 = vector.shape_cast %148 : vector<1x256xf32> to vector<1x1x256xf32>
    tpu.vector_store %arg5[%c0_72, %c5_73, %c0_74], %151 {strides = array<i32>} : memref<1x8x256xf32, #tpu.memory_space<vmem>>, vector<1x1x256xf32>,
    %152 = vector.extract_strided_slice %1 {offsets = [0, 0], sizes = [1, 256], strides = [1, 1]} : vector<4x256xf32> to vector<1x256xf32>
    %c0_75 = arith.constant 0 : index
    %c6 = arith.constant 6 : index
    %153 = memref.load %arg3[%c0_75, %c6] : memref<4x8xf32, #tpu.memory_space<smem>>
    %154 = vector.broadcast %153 : f32 to vector<1x256xf32>
    %155 = arith.mulf %152, %154 : vector<1x256xf32>
    %156 = vector.extract_strided_slice %1 {offsets = [1, 0], sizes = [1, 256], strides = [1, 1]} : vector<4x256xf32> to vector<1x256xf32>
    %c1_76 = arith.constant 1 : index
    %c6_77 = arith.constant 6 : index
    %157 = memref.load %arg3[%c1_76, %c6_77] : memref<4x8xf32, #tpu.memory_space<smem>>
    %158 = vector.broadcast %157 : f32 to vector<1x256xf32>
    %159 = arith.mulf %156, %158 : vector<1x256xf32>
    %160 = arith.addf %155, %159 : vector<1x256xf32>
    %161 = vector.extract_strided_slice %1 {offsets = [2, 0], sizes = [1, 256], strides = [1, 1]} : vector<4x256xf32> to vector<1x256xf32>
    %c2_78 = arith.constant 2 : index
    %c6_79 = arith.constant 6 : index
    %162 = memref.load %arg3[%c2_78, %c6_79] : memref<4x8xf32, #tpu.memory_space<smem>>
    %163 = vector.broadcast %162 : f32 to vector<1x256xf32>
    %164 = arith.mulf %161, %163 : vector<1x256xf32>
    %165 = arith.addf %160, %164 : vector<1x256xf32>
    %166 = vector.extract_strided_slice %1 {offsets = [3, 0], sizes = [1, 256], strides = [1, 1]} : vector<4x256xf32> to vector<1x256xf32>
    %c3_80 = arith.constant 3 : index
    %c6_81 = arith.constant 6 : index
    %167 = memref.load %arg3[%c3_80, %c6_81] : memref<4x8xf32, #tpu.memory_space<smem>>
    %168 = vector.broadcast %167 : f32 to vector<1x256xf32>
    %169 = arith.mulf %166, %168 : vector<1x256xf32>
    %170 = arith.addf %165, %169 : vector<1x256xf32>
    %c0_82 = arith.constant 0 : index
    %c6_83 = arith.constant 6 : index
    %171 = memref.load %arg4[%c0_82, %c6_83] : memref<1x8xf32, #tpu.memory_space<smem>>
    %172 = vector.broadcast %171 : f32 to vector<1x256xf32>
    %173 = arith.addf %170, %172 : vector<1x256xf32>
    %c0_84 = arith.constant 0 : index
    %c6_85 = arith.constant 6 : index
    %c0_86 = arith.constant 0 : index
    %174 = vector.load %arg5[%c0_84, %c6_85, %c0_86] : memref<1x8x256xf32, #tpu.memory_space<vmem>>, vector<1x1x256xf32>
    %175 = vector.shape_cast %174 : vector<1x1x256xf32> to vector<1x256xf32>
    %176 = vector.shape_cast %173 : vector<1x256xf32> to vector<1x1x256xf32>
    tpu.vector_store %arg5[%c0_84, %c6_85, %c0_86], %176 {strides = array<i32>} : memref<1x8x256xf32, #tpu.memory_space<vmem>>, vector<1x1x256xf32>,
    %177 = vector.extract_strided_slice %1 {offsets = [0, 0], sizes = [1, 256], strides = [1, 1]} : vector<4x256xf32> to vector<1x256xf32>
    %c0_87 = arith.constant 0 : index
    %c7 = arith.constant 7 : index
    %178 = memref.load %arg3[%c0_87, %c7] : memref<4x8xf32, #tpu.memory_space<smem>>
    %179 = vector.broadcast %178 : f32 to vector<1x256xf32>
    %180 = arith.mulf %177, %179 : vector<1x256xf32>
    %181 = vector.extract_strided_slice %1 {offsets = [1, 0], sizes = [1, 256], strides = [1, 1]} : vector<4x256xf32> to vector<1x256xf32>
    %c1_88 = arith.constant 1 : index
    %c7_89 = arith.constant 7 : index
    %182 = memref.load %arg3[%c1_88, %c7_89] : memref<4x8xf32, #tpu.memory_space<smem>>
    %183 = vector.broadcast %182 : f32 to vector<1x256xf32>
    %184 = arith.mulf %181, %183 : vector<1x256xf32>
    %185 = arith.addf %180, %184 : vector<1x256xf32>
    %186 = vector.extract_strided_slice %1 {offsets = [2, 0], sizes = [1, 256], strides = [1, 1]} : vector<4x256xf32> to vector<1x256xf32>
    %c2_90 = arith.constant 2 : index
    %c7_91 = arith.constant 7 : index
    %187 = memref.load %arg3[%c2_90, %c7_91] : memref<4x8xf32, #tpu.memory_space<smem>>
    %188 = vector.broadcast %187 : f32 to vector<1x256xf32>
    %189 = arith.mulf %186, %188 : vector<1x256xf32>
    %190 = arith.addf %185, %189 : vector<1x256xf32>
    %191 = vector.extract_strided_slice %1 {offsets = [3, 0], sizes = [1, 256], strides = [1, 1]} : vector<4x256xf32> to vector<1x256xf32>
    %c3_92 = arith.constant 3 : index
    %c7_93 = arith.constant 7 : index
    %192 = memref.load %arg3[%c3_92, %c7_93] : memref<4x8xf32, #tpu.memory_space<smem>>
    %193 = vector.broadcast %192 : f32 to vector<1x256xf32>
    %194 = arith.mulf %191, %193 : vector<1x256xf32>
    %195 = arith.addf %190, %194 : vector<1x256xf32>
    %c0_94 = arith.constant 0 : index
    %c7_95 = arith.constant 7 : index
    %196 = memref.load %arg4[%c0_94, %c7_95] : memref<1x8xf32, #tpu.memory_space<smem>>
    %197 = vector.broadcast %196 : f32 to vector<1x256xf32>
    %198 = arith.addf %195, %197 : vector<1x256xf32>
    %c0_96 = arith.constant 0 : index
    %c7_97 = arith.constant 7 : index
    %c0_98 = arith.constant 0 : index
    %199 = vector.load %arg5[%c0_96, %c7_97, %c0_98] : memref<1x8x256xf32, #tpu.memory_space<vmem>>, vector<1x1x256xf32>
    %200 = vector.shape_cast %199 : vector<1x1x256xf32> to vector<1x256xf32>
    %201 = vector.shape_cast %198 : vector<1x256xf32> to vector<1x1x256xf32>
    tpu.vector_store %arg5[%c0_96, %c7_97, %c0_98], %201 {strides = array<i32>} : memref<1x8x256xf32, #tpu.memory_space<vmem>>, vector<1x1x256xf32>,
    return
  }
  func.func @transform_0(%arg0: i32, %arg1: i32) -> (i32, i32, i32) {
    %c0_i32 = arith.constant 0 : i32
    %c0_i32_0 = arith.constant 0 : i32
    return %arg0, %c0_i32, %arg1 : i32, i32, i32
  }
  func.func @transform_1(%arg0: i32, %arg1: i32) -> (i32, i32) {
    %c0_i32 = arith.constant 0 : i32
    %c0_i32_0 = arith.constant 0 : i32
    %c0_i32_1 = arith.constant 0 : i32
    return %c0_i32, %c0_i32_0 : i32, i32
  }
  func.func @transform_2(%arg0: i32, %arg1: i32) -> (i32, i32) {
    %c0_i32 = arith.constant 0 : i32
    %c0_i32_0 = arith.constant 0 : i32
    %c0_i32_1 = arith.constant 0 : i32
    return %c0_i32, %c0_i32_0 : i32, i32
  }
  func.func @transform_3(%arg0: i32, %arg1: i32) -> (i32, i32, i32) {
    %c0_i32 = arith.constant 0 : i32
    %c0_i32_0 = arith.constant 0 : i32
    return %arg0, %c0_i32, %arg1 : i32, i32, i32
  }
}

</mosaic_0001>

<bundles_post_ra>
// kernel: normalization_wrapper_forward.1
= control target key start
LH: loop header
LB: loop body
LE: loop exit
PB: predicated region body
PF: predicated region fallthrough
CT: control target
= control target key end

     0   :  { %8 = vsyncpa [#allocation3], 0  ;;  %s1202_s0 = inlined_call_operand.vmem [shape: f32[2,4,256], index: 0, kind: input, shape index: {}]   ;;  %s1203_s1 = inlined_call_operand.vmem [shape: f32[4,8], index: 1, kind: input, shape index: {}]   ;;  %s1204_s2 = inlined_call_operand.vmem [shape: f32[1,8], index: 2, kind: input, shape index: {}]   ;;  %s1205_s3 = inlined_call_operand.vmem [shape: f32[2,8,256], index: 3, kind: output, shape index: {}]  }
   0x1   :  { %9 = vsyncpa [#allocation5], 0  ;;  %s959_s12 = smov 0   ;;  %s961_s13 = smov 0  }
   0x2   :  { %s963_s14 = smov 0  }
   0x3 LB: > { %s742_s15 = sadd.s32 4294967295, %s934_s14   ;;  %s27_s16 = sadd.s32 1, %s930_s13  ;;  %s934_s14 = sphi %s963_s14, %s15_s14   ;;  %s930_s13 = sphi %s961_s13, %s1217_s13   ;;  %s926_s12 = sphi %s959_s12, %s1216_s12  }
   0x4   : > { %p29_p0 = scmp.ge.s32.totalorder %s27_s16, 2  ;;  %p744_p1 = scmp.ge.s32.totalorder %s934_s14, 1 }
   0x5   : > { %p130_p2 = scmp.lt.s32.totalorder %s934_s14, 3  ;;  %p984_p4 = scmp.eq.s32.totalorder %s742_s15, 0 }
   0x6   : > { %s1219_s16 = smov (%p29_p0, %s27_s16), 0  ;;  %s143_s21 = sshll.u32 %s1203_s1, 4  ;;  %s144_s21 = int_to_ptr.vmem [resolvable:$true] %s143_s21 }
   0x7   : > { %p980_p3 = pnand %p744_p1, %p130_p2  ;;  %s154_s24 = sshll.u32 %s1204_s2, 4  ;;  %s155_s24 = int_to_ptr.vmem [resolvable:$true] %s154_s24 }
   0x8   : > { %s1210_s18 = scalar_select %p984_p4, 1, 0 }
   0x9   : > { %s1209_s17 = scalar_select %p980_p3, 1, 0 }
   0xa   : > { %p836_p5 = pneg %p980_p3  ;;  %s874_s26 = scalar_lea.vmem %s144_s21, 64 }
   0xb   : > { %p875_p7 = scmp.ne.s32.totalorder %s144_s21, %s874_s26  ;;  %p882_p11 = scmp.lt.s32.totalorder %s144_s21, %s144_s21 }
   0xc   : > { %p998_p6 = pnand %p984_p4, %p836_p5  ;;  %p883_p12 = scmp.lt.s32.totalorder %s874_s26, %s874_s26 }
   0xe   : > { %p876_p8 = pneg %p998_p6  ;;  %p884_p13 = por %p883_p12, %p882_p11 }
  0x10   : > { %p877_p9 = pnand %p876_p8, %p875_p7 }
  0x12   : > { %p878_p10 = pneg %p877_p9 }
  0x14   : > { %p885_p0 = pnand %p884_p13, %p878_p10 }
  0x16   : > { %888 = shalt.err (!%p885_p0)
}
  0x17   : > { %s936_s27 = smov [#allocation2]   ;;  %s889_s28 = scalar_lea.vmem %s155_s24, 16 }
  0x18   : > { %839 = dma.vmem_to_smem (!%p998_p6), %s144_s21, 64, %s936_s27, [#allocation3]  }
  0x19   : > { %p890_p1 = scmp.ne.s32.totalorder %s155_s24, %s889_s28  ;;  %p897_p4 = scmp.lt.s32.totalorder %s155_s24, %s155_s24 }
  0x1a   : > { %p898_p3 = scmp.lt.s32.totalorder %s889_s28, %s889_s28 }
  0x1b   : > { %p892_p2 = pnand %p890_p1, %p876_p8 }
  0x1c   : > { %p899_p7 = por %p898_p3, %p897_p4 }
  0x1d   : > { %p893_p5 = pneg %p892_p2 }
  0x1f   : > { %p900_p9 = pnand %p899_p7, %p893_p5 }
  0x21   : > { %903 = shalt.err (!%p900_p9)
}
  0x22   : > { %s937_s29 = smov [#allocation4]   ;;  %p1212_p10 = scmp.ne.s32.totalorder %s1209_s17, 0 }
  0x23   : > { %842 = dma.vmem_to_smem (!%p998_p6), %s155_s24, 16, %s937_s29, [#allocation5]  }
  0x24   : > { %180 = sbr.rel (%p1212_p10) target bundleno = 107 (0x6b), region = 32  ;;  %p1213_p11 = scmp.ne.s32.totalorder (!%p1212_p10), %s1210_s18, 0 }
  0x29   : > { %917 = dma.done.wait (%p1213_p11), [#allocation3], 64  }
  0x2a   : > { %919 = vsyncadd (%p1213_p11), [#allocation3], 4294967232 }
  0x2b   : > { %921 = dma.done.wait (%p1213_p11), [#allocation5], 16  }
  0x2c   : > { %923 = vsyncadd (%p1213_p11), [#allocation5], 4294967280 }
  0x2d   : > { %190 = sfence }
  0x2e   : > { %p218_p3 = scmp.lt.s32.totalorder %s926_s12, 1  ;;  %s238_s30 = sld [smem:[#allocation2]]  ;;  %v938_v6 = vmov 1966171168   ;;  %v272_v8 = vlaneseq }
  0x2f   : > { %s755_s4 = sld [smem:[#allocation2 + $0x80]]  ;;  %v270_v7 = vunpack.c.l.s4 %v938_v6 }
  0x30   : > { %s1221_s12 = smov (!%p218_p3, %s926_s12), 1  ;;  %s757_s5 = sld [smem:[#allocation2 + $0x100]]  ;;  %v273_v16 = vshrl.u32 %v272_v8, 7  ;;  %vm1067_vm0 = vcmp.lt.s32.totalorder %v272_v8, 256 }
  0x31   : > { %s826_s6 = sshll.u32 %s1221_s12, 3  ;;  %s759_s10 = sld [smem:[#allocation2 + $0x180]]  ;;  %v271_v15 = vunpack.c.0.s8 %v270_v7 }
  0x32   : > { %s225_s9 = scalar_lea.vmem %s1202_s0, %s826_s6  ;;  %s1028_s11 = sld [smem:[#allocation4]] }
  0x33   : > { %v1026_v0 = vld [vmem:[%s225_s9] sm:$0xff]  ;;  %s761_s15 = sld [smem:[#allocation2 + $0x1]]  ;;  %v1043_v26 = vsub.s32 %v271_v15, %v273_v16  ;;  %s827_s27 = sshll.u32 %s1221_s12, 4 }
  0x34   : > { %v239_v1 = vstv %s238_s30  ;;  %s762_s17 = sld [smem:[#allocation2 + $0x81]] }
  0x35   : > { %v242_v2 = vstv %s755_s4  ;;  %v240_v3 = vmul.f32 %v239_v1, %v1026_v0  ;;  %s764_s18 = sld [smem:[#allocation2 + $0x101]] }
  0x36   : > { %v243_v4 = vmul.f32 %v242_v2, %v1026_v0  ;;  %v250_v5 = vstv %s757_s5  ;;  %s766_s19 = sld [smem:[#allocation2 + $0x181]]  ;;  %s1065_s5 = scalar_lea.vmem %s1205_s3, %s827_s27 }
  0x37   : > { %v251_v10 = vmul.f32 %v250_v5, %v1026_v0  ;;  %v258_v13 = vstv %s759_s10  ;;  %s1033_s20 = sld [smem:[#allocation4 + $0x1]] }
  0x38   : > { %v756_v9 = vrot.slane %v243_v4, 9  ;;  %v259_v14 = vmul.f32 %v258_v13, %v1026_v0  ;;  %s770_s21 = sld [smem:[#allocation2 + $0x2]]  ;;  %v266_v21 = vstv %s1028_s11 }
  0x39   : > { %v758_v12 = vrot.slane %v251_v10, 10  ;;  %v291_v18 = vstv %s761_s15  ;;  %s771_s22 = sld [smem:[#allocation2 + $0x82]] }
  0x3a   : > { %v248_v11 = vadd.f32 %v756_v9, %v240_v3  ;;  %v760_v19 = vrot.slane %v259_v14, 11  ;;  %v294_v20 = vstv %s762_s17  ;;  %s1036_s23 = sld [smem:[#allocation2 + $0x102]]  ;;  %v292_v22 = vmul.f32 %v291_v18, %v1026_v0 }
  0x3b   : > { %v295_v23 = vmul.f32 %v294_v20, %v1026_v0  ;;  %v302_v24 = vstv %s764_s18  ;;  %s1041_s24 = sld [smem:[#allocation2 + $0x182]] }
  0x3c   : > { %v256_v17 = vadd.f32 %v758_v12, %v248_v11  ;;  %v303_v27 = vmul.f32 %v302_v24, %v1026_v0  ;;  %v310_v28 = vstv %s766_s19  ;;  %s1046_s25 = sld [smem:[#allocation4 + $0x2]] }
  0x3d   : > { %v763_v29 = vrot.slane %v295_v23, 9  ;;  %v311_v30 = vmul.f32 %v310_v28, %v1026_v0  ;;  %s1049_s26 = sld [smem:[#allocation2 + $0x3]]  ;;  %v318_v46 = vstv %s1033_s20 }
  0x3e   : > { %v264_v25 = vadd.f32 %v760_v19, %v256_v17  ;;  %v765_v32 = vrot.slane %v303_v27, 10  ;;  %v340_v33 = vstv %s770_s21  ;;  %s1052_s28 = sld [smem:[#allocation2 + $0x83]] }
  0x3f   : > { %v300_v34 = vadd.f32 %v763_v29, %v292_v22  ;;  %v767_v35 = vrot.slane %v311_v30, 11  ;;  %v343_v36 = vstv %s771_s22  ;;  %s1054_s29 = sld [smem:[#allocation2 + $0x103]]  ;;  %v341_v38 = vmul.f32 %v340_v33, %v1026_v0 }
  0x40   : > { %v267_v31 = vadd.f32 %v266_v21, %v264_v25  ;;  %v344_v39 = vmul.f32 %v343_v36, %v1026_v0  ;;  %v351_v40 = vstv %s1036_s23  ;;  %s1060_s12 = sld [smem:[#allocation2 + $0x183]] }
  0x41   : > { %v308_v42 = vadd.f32 %v765_v32, %v300_v34  ;;  %v352_v43 = vmul.f32 %v351_v40, %v1026_v0  ;;  %v359_v44 = vstv %s1041_s24  ;;  %s1073_s6 = sld [smem:[#allocation4 + $0x3]] }
  0x42   : > { %v275_v37 = vrot.slane %v267_v31, %v1043_v26  ;;  %v772_v47 = vrot.slane %v344_v39, 9  ;;  %v360_v48 = vmul.f32 %v359_v44, %v1026_v0  ;;  %s1078_s7 = sld [smem:[#allocation2 + $0x4]]  ;;  %v367_v63 = vstv %s1046_s25 }
  0x43   : > { %v316_v49 = vadd.f32 %v767_v35, %v308_v42  ;;  %v774_v50 = vrot.slane %v352_v43, 10  ;;  %v389_v51 = vstv %s1049_s26  ;;  %s1081_s8 = sld [smem:[#allocation2 + $0x84]] }
  0x44   : > { %v282_v45 = vrot.slane %v275_v37, %v1043_v26  ;;  %v349_v52 = vadd.f32 %v772_v47, %v341_v38  ;;  %v776_v53 = vrot.slane %v360_v48, 11  ;;  %v392_v54 = vstv %s1052_s28  ;;  %s1087_s9 = sld [smem:[#allocation2 + $0x104]] }
  0x45   : > { %v319_v55 = vadd.f32 %v318_v46, %v316_v49  ;;  %v390_v56 = vmul.f32 %v389_v51, %v1026_v0  ;;  %v393_v57 = vmul.f32 %v392_v54, %v1026_v0  ;;  %v400_v58 = vstv %s1054_s29  ;;  %s1092_s10 = sld [smem:[#allocation2 + $0x184]] }
  0x46   : > { %288 = vst.msk [vmem:[%s1065_s5] ss:$8 sm:$0x3] %vm1067_vm0, %v282_v45  ;;  %v357_v59 = vadd.f32 %v774_v50, %v349_v52  ;;  %v401_v60 = vmul.f32 %v400_v58, %v1026_v0  ;;  %v408_v61 = vstv %s1060_s12  ;;  %s1096_s11 = sld [smem:[#allocation4 + $0x4]] }
  0x47   : > { %v327_v62 = vrot.slane %v319_v55, %v1043_v26  ;;  %v781_v1 = vrot.slane %v393_v57, 9  ;;  %v409_v2 = vmul.f32 %v408_v61, %v1026_v0  ;;  %s1101_s15 = sld [smem:[#allocation2 + $0x5]]  ;;  %v416_v18 = vstv %s1073_s6 }
  0x48   : > { %v365_v3 = vadd.f32 %v776_v53, %v357_v59  ;;  %v783_v4 = vrot.slane %v401_v60, 10  ;;  %v438_v5 = vstv %s1078_s7  ;;  %s1104_s17 = sld [smem:[#allocation2 + $0x85]] }
  0x49   : > { %v334_v6 = vrot.slane %v327_v62, %v1043_v26  ;;  %v398_v7 = vadd.f32 %v781_v1, %v390_v56  ;;  %v785_v8 = vrot.slane %v409_v2, 11  ;;  %s1107_s18 = sld [smem:[#allocation2 + $0x105]]  ;;  %v439_v10 = vmul.f32 %v438_v5, %v1026_v0 }
  0x4a   : > { %v368_v9 = vadd.f32 %v367_v63, %v365_v3  ;;  %v441_v11 = vstv %s1081_s8  ;;  %v449_v12 = vstv %s1087_s9  ;;  %s1112_s19 = sld [smem:[#allocation2 + $0x185]] }
  0x4b   : > { %769 = vst.msk [vmem:[%s1065_s5 + $0x1] ss:$8 sm:$0x3] %vm1067_vm0, %v334_v6  ;;  %v406_v13 = vadd.f32 %v783_v4, %v398_v7  ;;  %v442_v14 = vmul.f32 %v441_v11, %v1026_v0  ;;  %v450_v15 = vmul.f32 %v449_v12, %v1026_v0  ;;  %v457_v16 = vstv %s1092_s10  ;;  %s1120_s20 = sld [smem:[#allocation4 + $0x5]] }
  0x4c   : > { %v376_v17 = vrot.slane %v368_v9, %v1043_v26  ;;  %v458_v19 = vmul.f32 %v457_v16, %v1026_v0  ;;  %s1125_s21 = sld [smem:[#allocation2 + $0x6]]  ;;  %v465_v39 = vstv %s1096_s11 }
  0x4d   : > { %v414_v20 = vadd.f32 %v785_v8, %v406_v13  ;;  %v790_v21 = vrot.slane %v442_v14, 9  ;;  %v792_v22 = vrot.slane %v450_v15, 10  ;;  %v487_v23 = vstv %s1101_s15  ;;  %s1128_s22 = sld [smem:[#allocation2 + $0x86]] }
  0x4e   : > { %v383_v24 = vrot.slane %v376_v17, %v1043_v26  ;;  %v794_v25 = vrot.slane %v458_v19, 11  ;;  %v488_v27 = vmul.f32 %v487_v23, %v1026_v0  ;;  %v490_v28 = vstv %s1104_s17  ;;  %s1133_s23 = sld [smem:[#allocation2 + $0x106]] }
  0x4f   : > { %v417_v29 = vadd.f32 %v416_v18, %v414_v20  ;;  %v447_v30 = vadd.f32 %v790_v21, %v439_v10  ;;  %v491_v31 = vmul.f32 %v490_v28, %v1026_v0  ;;  %v498_v32 = vstv %s1107_s18  ;;  %s1137_s24 = sld [smem:[#allocation2 + $0x186]] }
  0x50   : > { %778 = vst.msk [vmem:[%s1065_s5 + $0x2] ss:$8 sm:$0x3] %vm1067_vm0, %v383_v24  ;;  %v499_v33 = vmul.f32 %v498_v32, %v1026_v0  ;;  %v506_v34 = vstv %s1112_s19  ;;  %s1144_s25 = sld [smem:[#allocation4 + $0x6]] }
  0x51   : > { %v425_v35 = vrot.slane %v417_v29, %v1043_v26  ;;  %v455_v36 = vadd.f32 %v792_v22, %v447_v30  ;;  %v799_v37 = vrot.slane %v491_v31, 9  ;;  %v507_v38 = vmul.f32 %v506_v34, %v1026_v0  ;;  %s1148_s26 = sld [smem:[#allocation2 + $0x7]] }
  0x52   : > { %v801_v40 = vrot.slane %v499_v33, 10  ;;  %v536_v42 = vstv %s1125_s21  ;;  %s816_s27 = sld [smem:[#allocation2 + $0x87]]  ;;  %v514_v54 = vstv %s1120_s20 }
  0x53   : > { %v432_v43 = vrot.slane %v425_v35, %v1043_v26  ;;  %v463_v44 = vadd.f32 %v794_v25, %v455_v36  ;;  %v496_v45 = vadd.f32 %v799_v37, %v488_v27  ;;  %v803_v46 = vrot.slane %v507_v38, 11  ;;  %s1153_s28 = sld [smem:[#allocation2 + $0x107]] }
  0x54   : > { %v537_v47 = vmul.f32 %v536_v42, %v1026_v0  ;;  %v539_v48 = vstv %s1128_s22  ;;  %v547_v49 = vstv %s1133_s23  ;;  %s820_s29 = sld [smem:[#allocation2 + $0x187]] }
  0x55   : > { %787 = vst.msk [vmem:[%s1065_s5 + $0x3] ss:$8 sm:$0x3] %vm1067_vm0, %v432_v43  ;;  %v466_v50 = vadd.f32 %v465_v39, %v463_v44  ;;  %v504_v51 = vadd.f32 %v801_v40, %v496_v45  ;;  %v540_v52 = vmul.f32 %v539_v48, %v1026_v0  ;;  %v548_v53 = vmul.f32 %v547_v49, %v1026_v0  ;;  %s822_s12 = sld [smem:[#allocation4 + $0x7]] }
  0x56   : > { %v555_v55 = vstv %s1137_s24  ;;  %v563_v12 = vstv %s1144_s25 }
  0x57   : > { %v474_v56 = vrot.slane %v466_v50, %v1043_v26  ;;  %v512_v57 = vadd.f32 %v803_v46, %v504_v51  ;;  %v808_v58 = vrot.slane %v540_v52, 9  ;;  %v810_v59 = vrot.slane %v548_v53, 10 }
  0x58   : > { %v556_v60 = vmul.f32 %v555_v55, %v1026_v0  ;;  %v585_v61 = vstv %s1148_s26  ;;  %v588_v62 = vstv %s816_s27 }
  0x59   : > { %v481_v63 = vrot.slane %v474_v56, %v1043_v26  ;;  %v515_v1 = vadd.f32 %v514_v54, %v512_v57  ;;  %v545_v2 = vadd.f32 %v808_v58, %v537_v47  ;;  %v586_v3 = vmul.f32 %v585_v61, %v1026_v0 }
  0x5a   : > { %v812_v4 = vrot.slane %v556_v60, 11  ;;  %v589_v5 = vmul.f32 %v588_v62, %v1026_v0  ;;  %v596_v6 = vstv %s1153_s28  ;;  %v604_v7 = vstv %s820_s29 }
  0x5b   : > { %796 = vst.msk [vmem:[%s1065_s5 + $0x4] ss:$8 sm:$0x3] %vm1067_vm0, %v481_v63  ;;  %v523_v8 = vrot.slane %v515_v1, %v1043_v26  ;;  %v553_v9 = vadd.f32 %v810_v59, %v545_v2  ;;  %v597_v10 = vmul.f32 %v596_v6, %v1026_v0  ;;  %v605_v11 = vmul.f32 %v604_v7, %v1026_v0 }
  0x5c   : > { %v817_v13 = vrot.slane %v589_v5, 9  ;;  %v612_v22 = vstv %s822_s12 }
  0x5d   : > { %v530_v14 = vrot.slane %v523_v8, %v1043_v26  ;;  %v561_v15 = vadd.f32 %v812_v4, %v553_v9  ;;  %v819_v16 = vrot.slane %v597_v10, 10  ;;  %v821_v18 = vrot.slane %v605_v11, 11 }
  0x5e   : > { %v594_v17 = vadd.f32 %v817_v13, %v586_v3 }
  0x5f   : > { %805 = vst.msk [vmem:[%s1065_s5 + $0x5] ss:$8 sm:$0x3] %vm1067_vm0, %v530_v14  ;;  %v564_v19 = vadd.f32 %v563_v12, %v561_v15 }
  0x60   : > { %v602_v20 = vadd.f32 %v819_v16, %v594_v17 }
  0x61   : > { %v572_v21 = vrot.slane %v564_v19, %v1043_v26 }
  0x62   : > { %v610_v23 = vadd.f32 %v821_v18, %v602_v20 }
  0x63   : > { %v579_v0 = vrot.slane %v572_v21, %v1043_v26 }
  0x64   : > { %v613_v24 = vadd.f32 %v612_v22, %v610_v23 }
  0x65   : > { %814 = vst.msk [vmem:[%s1065_s5 + $0x6] ss:$8 sm:$0x3] %vm1067_vm0, %v579_v0 }
  0x66   : > { %v621_v25 = vrot.slane %v613_v24, %v1043_v26 }
  0x68   : > { %v628_v27 = vrot.slane %v621_v25, %v1043_v26 }
  0x6a   : > { %823 = vst.msk [vmem:[%s1065_s5 + $0x7] ss:$8 sm:$0x3] %vm1067_vm0, %v628_v27 }
  0x6b PF: > { %s15_s14 = sadd.s32 1, %s934_s14   ;;  %s1216_s12 = smov %s930_s13 }
  0x6c   : > { %p12_p4 = scmp.ge.s32.totalorder %s15_s14, 4   ;;  %s1217_s13 = smov %s1219_s16 }
  0x6e   :  { %14 = sbr.rel (!%p12_p4) target bundleno = 3 (0x3), region = 78 }
  0x73   :  { %663 = vsyncpa [#allocation3], 1 }
  0x74   :  { %665 = vsyncpa [#allocation3 + $0x1], 1 }
  0x75   :  { %666 = vsyncpa [#allocation5], 1 }

</bundles_post_ra>
